<compile_context>
chip_gen: v5e
topology: v5e:2x2
jax: 0.10.0
libtpu: 0.0.40
codegen_flags: <defaults>
</compile_context>

<pallas_src>
import jax
import jax.numpy as jnp
from jax.experimental import pallas as pl
from jax.experimental.pallas import tpu as pltpu

_MIB = 1024 * 1024

# Probed lazily on first call: whether this JAX/Mosaic build honors
# pipeline_mode=pl.Buffered(1) on the main pallas_call pipeline (used to
# single-buffer the grid-resident weight blocks). Falls back cleanly if not.
_SINGLE_BUFFER_WEIGHTS = None


def _adapter_kernel(x_ref, wd_ref, bd_ref, wu_ref, bu_ref, scale_ref, o_ref):
    # x_ref:     (TM, D)   token tile (streamed)
    # wd_ref:    (D, Rp)   down-proj weight, pre-transposed to (in, out)
    # bd_ref:    (1, Rp)
    # wu_ref:    (Rp, D)   up-proj weight, pre-transposed to (in, out)
    # bu_ref:    (1, D)
    # scale_ref: (1,)      f32 scalar in SMEM
    # o_ref:     (TM, D)
    x = x_ref[...]
    # Canonical (M,K)@(K,N) contraction -> no in-kernel RHS transpose.
    down = jnp.dot(x, wd_ref[...], preferred_element_type=jnp.float32)
    down = jnp.maximum(down + bd_ref[...].astype(jnp.float32), 0.0)   # bias + ReLU (f32)
    # TODO(synk): training-mode dropout with p>0.0 not implemented; module default p=0.0.
    up = jnp.dot(down.astype(wu_ref.dtype), wu_ref[...],
                 preferred_element_type=jnp.float32)
    up = (up + bu_ref[...].astype(jnp.float32)) * scale_ref[0]        # f32 epilogue
    o_ref[...] = up.astype(o_ref.dtype)                               # single cast


def _vmem_need_bytes(tm, D, Rp, x_bytes, w_bytes):
    """Conservative per-kernel VMEM estimate for tile height `tm`."""
    stream = 2 * (2 * tm * D * x_bytes)       # x + out blocks, double-buffered
    weights = 2 * (2 * D * Rp * w_bytes)      # Wd^T + Wu^T (budget 2 buffers each)
    biases = 2 * (Rp + D) * w_bytes
    interm = tm * (Rp + 2 * D) * 4            # f32 down/up intermediates
    return stream + weights + biases + interm + (1 << 20)


def _pick_tile(M, D, Rp, x_bytes, w_bytes, tm_request):
    """Generation-aware token-tile height + explicit scoped-VMEM limit."""
    try:
        vmem_cap = int(pltpu.get_tpu_info().vmem_capacity_bytes)
    except Exception:
        vmem_cap = 64 * _MIB                  # conservative default (v7x per-TC)
    budget = int(0.7 * vmem_cap)              # headroom for compiler-internal scratch

    if tm_request is not None:
        tm = min(tm_request, M)
        if tm < M:
            tm = max(8, (tm // 8) * 8)        # keep (8, 128) tiling legal
    else:
        # Keep >= 2 grid steps when M allows so both v7x TensorCores get work
        # via the "parallel" axis; no effect on v5e/v6e (1 TC per chip).
        step_cap = M if M <= 8 else max(8, (M // 2) // 8 * 8)
        tm = None
        for cand in (1024, 512, 256, 128, 64, 32, 16, 8):
            if cand > step_cap:
                continue
            if _vmem_need_bytes(cand, D, Rp, x_bytes, w_bytes) <= budget:
                tm = cand
                break
        if tm is None:
            tm = min(M, 8)

    need = _vmem_need_bytes(tm, D, Rp, x_bytes, w_bytes)
    vmem_limit = int(min(vmem_cap, max(need * 3 // 2 + 2 * _MIB, 16 * _MIB)))
    return tm, vmem_limit


def _build_call(M, D, Rp, TM, out_dtype, vmem_limit, single_buffer_weights):
    def resident(shape):
        # Constant index_map -> block is DMA'd once and stays resident.
        if single_buffer_weights:
            return pl.BlockSpec(shape, lambda i: (0, 0),
                                pipeline_mode=pl.Buffered(1))
        return pl.BlockSpec(shape, lambda i: (0, 0))

    return pl.pallas_call(
        _adapter_kernel,
        out_shape=jax.ShapeDtypeStruct((M, D), out_dtype),
        grid=(pl.cdiv(M, TM),),
        in_specs=[
            pl.BlockSpec((TM, D), lambda i: (i, 0)),             # x: streamed tokens
            resident((D, Rp)),                                   # Wd^T
            resident((1, Rp)),                                   # bd
            resident((Rp, D)),                                   # Wu^T
            resident((1, D)),                                    # bu
            pl.BlockSpec(memory_space=pltpu.MemorySpace.SMEM),   # scale scalar
        ],
        out_specs=pl.BlockSpec((TM, D), lambda i: (i, 0)),
        compiler_params=pltpu.CompilerParams(
            dimension_semantics=("parallel",),
            vmem_limit_bytes=vmem_limit),
    )


def prepare_adapter_params(w_down, b_down, w_up, b_up, scale):
    """One-time conversion of PyTorch-layout params to the kernel layout.

    Pads the bottleneck R up to Rp (multiple of 128 lanes) and pre-transposes
    both weights so the kernel runs plain (M,K)@(K,N) MXU contractions.  Call
    once (e.g. at parameter-load time), NOT per forward call.
    """
    R, D = w_down.shape
    Rp = ((R + 127) // 128) * 128
    if Rp != R:
        w_down = jnp.pad(w_down, ((0, Rp - R), (0, 0)))
        b_down = jnp.pad(b_down, ((0, Rp - R),))
        w_up = jnp.pad(w_up, ((0, 0), (0, Rp - R)))
    wd_t = jnp.transpose(w_down)              # (D, Rp)
    wu_t = jnp.transpose(w_up)                # (Rp, D)
    bd = b_down.reshape(1, Rp)
    bu = b_up.reshape(1, D)
    sc = jnp.asarray(scale, jnp.float32).reshape(1)
    return wd_t, bd, wu_t, bu, sc


def adapter_forward(x, wd_t, bd, wu_t, bu, scale, *, tm=None):
    """x: (B, S, D). Params from prepare_adapter_params(). Returns (B, S, D)."""
    global _SINGLE_BUFFER_WEIGHTS
    B, S, D = x.shape
    Rp = wd_t.shape[1]
    M = B * S
    x2 = x.reshape(M, D)

    TM, vmem_limit = _pick_tile(M, D, Rp,
                                jnp.dtype(x.dtype).itemsize,
                                jnp.dtype(wd_t.dtype).itemsize, tm)
    args = (x2, wd_t, bd, wu_t, bu, scale)

    if _SINGLE_BUFFER_WEIGHTS is None:
        # One-time probe: prefer single-buffered resident weights (frees VMEM
        # for a bigger token tile); fall back if this build rejects it.
        try:
            out2 = _build_call(M, D, Rp, TM, x.dtype, vmem_limit, True)(*args)
            _SINGLE_BUFFER_WEIGHTS = True
        except Exception:
            _SINGLE_BUFFER_WEIGHTS = False
            out2 = _build_call(M, D, Rp, TM, x.dtype, vmem_limit, False)(*args)
    else:
        out2 = _build_call(M, D, Rp, TM, x.dtype, vmem_limit,
                           _SINGLE_BUFFER_WEIGHTS)(*args)

    return out2.reshape(B, S, D)


def init_adapter_params(key, d_model, bottleneck, dtype=jnp.float32):
    """'lora' init matching the PyTorch module:
    down_proj.weight: kaiming_uniform_(a=sqrt(5)) -> U(-1/sqrt(fan_in), 1/sqrt(fan_in))
    up_proj.weight / biases: zeros.  scale: 1.0 (learnable_scalar)."""
    fan_in = d_model
    bound = 1.0 / (fan_in ** 0.5)
    w_down = jax.random.uniform(key, (bottleneck, d_model), dtype,
                                minval=-bound, maxval=bound)
    b_down = jnp.zeros((bottleneck,), dtype)
    w_up = jnp.zeros((d_model, bottleneck), dtype)
    b_up = jnp.zeros((d_model,), dtype)
    scale = jnp.ones((1,), dtype)
    return w_down, b_down, w_up, b_up, scale


if __name__ == "__main__":
    key = jax.random.PRNGKey(0)
    k_x, k_w = jax.random.split(key)

    B, S, D, R = 2, 8, 32, 64   # batch, seq, d_model, bottleneck (module default 64)
    x = jax.random.normal(k_x, (B, S, D), dtype=jnp.float32)
    w_down, b_down, w_up, b_up, scale = init_adapter_params(k_w, D, R)

    # lora init leaves up_proj at zero; perturb deterministically so the check
    # exercises the full path with non-trivial outputs and a non-unit scale.
    w_up = 0.01 * jax.random.normal(jax.random.PRNGKey(1), (D, R), jnp.float32)
    b_up = 0.01 * jax.random.normal(jax.random.PRNGKey(2), (D,), jnp.float32)
    scale = scale * 1.25

    params = prepare_adapter_params(w_down, b_down, w_up, b_up, scale)
    out = adapter_forward(x, *params)
    out = jax.block_until_ready(out)

    # Pure-JAX reference (uses the original, unpadded, untransposed parameters).
    ref = (jnp.maximum(x @ w_down.T + b_down, 0.0) @ w_up.T + b_up) * scale[0]
    assert out.shape == (B, S, D)
    assert jnp.allclose(out, ref, atol=1e-5, rtol=1e-5), "mismatch vs reference"

    print("KERNEL_OK")
</pallas_src>

<mosaic_0001>
module attributes {stable_mosaic.version = 11 : i64} {
  func.func @_adapter_kernel(%arg0: i32, %arg1: memref<8x32xf32, #tpu.memory_space<vmem>>, %arg2: memref<32x128xf32, #tpu.memory_space<vmem>>, %arg3: memref<1x128xf32, #tpu.memory_space<vmem>>, %arg4: memref<128x32xf32, #tpu.memory_space<vmem>>, %arg5: memref<1x32xf32, #tpu.memory_space<vmem>>, %arg6: memref<1xf32, #tpu.memory_space<smem>>, %arg7: memref<8x32xf32, #tpu.memory_space<vmem>>) attributes {dimension_semantics = [#tpu.dimension_semantics<parallel>], iteration_bounds = array<i64: 2>, scalar_prefetch = 0 : i64, scratch_operands = 0 : i64, tpu.core_type = #tpu.core_type<tc>, window_params = [{transform_indices = @transform_0, window_bounds = array<i64: 8, 32>}, {pipeline_mode = #tpu.pipeline_mode<synchronous>, transform_indices = @transform_1, window_bounds = array<i64: 32, 128>}, {pipeline_mode = #tpu.pipeline_mode<synchronous>, transform_indices = @transform_2, window_bounds = array<i64: 1, 128>}, {pipeline_mode = #tpu.pipeline_mode<synchronous>, transform_indices = @transform_3, window_bounds = array<i64: 128, 32>}, {pipeline_mode = #tpu.pipeline_mode<synchronous>, transform_indices = @transform_4, window_bounds = array<i64: 1, 32>}, {transform_indices = @transform_5, window_bounds = array<i64: 1>}, {transform_indices = @transform_6, window_bounds = array<i64: 8, 32>}]} {
    %c0 = arith.constant 0 : index
    %c0_0 = arith.constant 0 : index
    %0 = vector.load %arg1[%c0, %c0_0] : memref<8x32xf32, #tpu.memory_space<vmem>>, vector<8x32xf32>
    %c0_1 = arith.constant 0 : index
    %c0_2 = arith.constant 0 : index
    %1 = vector.load %arg2[%c0_1, %c0_2] : memref<32x128xf32, #tpu.memory_space<vmem>>, vector<32x128xf32>
    %cst = arith.constant dense<0.000000e+00> : vector<8x128xf32>
    %2 = tpu.matmul %0, %1, %cst {dimension_numbers = #tpu.dot_dimension_numbers<[1], [0], [0], [1], [0, 0, 1, 1], [], []>} : vector<8x32xf32>, vector<32x128xf32>, vector<8x128xf32> -> vector<8x128xf32>
    %c0_3 = arith.constant 0 : index
    %c0_4 = arith.constant 0 : index
    %3 = vector.load %arg3[%c0_3, %c0_4] : memref<1x128xf32, #tpu.memory_space<vmem>>, vector<1x128xf32>
    %4 = vector.broadcast %3 : vector<1x128xf32> to vector<8x128xf32>
    %5 = arith.addf %2, %4 : vector<8x128xf32>
    %cst_5 = arith.constant 0.000000e+00 : f32
    %6 = vector.broadcast %cst_5 : f32 to vector<8x128xf32>
    %7 = arith.maximumf %5, %6 : vector<8x128xf32>
    %c0_6 = arith.constant 0 : index
    %c0_7 = arith.constant 0 : index
    %8 = vector.load %arg4[%c0_6, %c0_7] : memref<128x32xf32, #tpu.memory_space<vmem>>, vector<128x32xf32>
    %cst_8 = arith.constant dense<0.000000e+00> : vector<8x32xf32>
    %9 = tpu.matmul %7, %8, %cst_8 {dimension_numbers = #tpu.dot_dimension_numbers<[1], [0], [0], [1], [0, 0, 1, 1], [], []>} : vector<8x128xf32>, vector<128x32xf32>, vector<8x32xf32> -> vector<8x32xf32>
    %c0_9 = arith.constant 0 : index
    %c0_10 = arith.constant 0 : index
    %10 = vector.load %arg5[%c0_9, %c0_10] : memref<1x32xf32, #tpu.memory_space<vmem>>, vector<1x32xf32>
    %11 = vector.broadcast %10 : vector<1x32xf32> to vector<8x32xf32>
    %12 = arith.addf %9, %11 : vector<8x32xf32>
    %c0_11 = arith.constant 0 : index
    %13 = memref.load %arg6[%c0_11] : memref<1xf32, #tpu.memory_space<smem>>
    %14 = vector.broadcast %13 : f32 to vector<8x32xf32>
    %15 = arith.mulf %12, %14 : vector<8x32xf32>
    %c0_12 = arith.constant 0 : index
    %c0_13 = arith.constant 0 : index
    %16 = vector.load %arg7[%c0_12, %c0_13] : memref<8x32xf32, #tpu.memory_space<vmem>>, vector<8x32xf32>
    tpu.vector_store %arg7[%c0_12, %c0_13], %15 {strides = array<i32>} : memref<8x32xf32, #tpu.memory_space<vmem>>, vector<8x32xf32>,
    return
  }
  func.func @transform_0(%arg0: i32) -> (i32, i32) {
    %c0_i32 = arith.constant 0 : i32
    %c0_i32_0 = arith.constant 0 : i32
    return %arg0, %c0_i32 : i32, i32
  }
  func.func @transform_1(%arg0: i32) -> (i32, i32) {
    %c0_i32 = arith.constant 0 : i32
    %c0_i32_0 = arith.constant 0 : i32
    %c0_i32_1 = arith.constant 0 : i32
    return %c0_i32, %c0_i32_0 : i32, i32
  }
  func.func @transform_2(%arg0: i32) -> (i32, i32) {
    %c0_i32 = arith.constant 0 : i32
    %c0_i32_0 = arith.constant 0 : i32
    %c0_i32_1 = arith.constant 0 : i32
    return %c0_i32, %c0_i32_0 : i32, i32
  }
  func.func @transform_3(%arg0: i32) -> (i32, i32) {
    %c0_i32 = arith.constant 0 : i32
    %c0_i32_0 = arith.constant 0 : i32
    %c0_i32_1 = arith.constant 0 : i32
    return %c0_i32, %c0_i32_0 : i32, i32
  }
  func.func @transform_4(%arg0: i32) -> (i32, i32) {
    %c0_i32 = arith.constant 0 : i32
    %c0_i32_0 = arith.constant 0 : i32
    %c0_i32_1 = arith.constant 0 : i32
    return %c0_i32, %c0_i32_0 : i32, i32
  }
  func.func @transform_5(%arg0: i32) -> i32 {
    %c0_i32 = arith.constant 0 : i32
    %c0_i32_0 = arith.constant 0 : i32
    return %c0_i32 : i32
  }
  func.func @transform_6(%arg0: i32) -> (i32, i32) {
    %c0_i32 = arith.constant 0 : i32
    %c0_i32_0 = arith.constant 0 : i32
    return %arg0, %c0_i32 : i32, i32
  }
}

module attributes {stable_mosaic.version = 11 : i64} {
  func.func @_adapter_kernel(%arg0: i32, %arg1: memref<8x32xf32, #tpu.memory_space<vmem>>, %arg2: memref<32x128xf32, #tpu.memory_space<vmem>>, %arg3: memref<1x128xf32, #tpu.memory_space<vmem>>, %arg4: memref<128x32xf32, #tpu.memory_space<vmem>>, %arg5: memref<1x32xf32, #tpu.memory_space<vmem>>, %arg6: memref<1xf32, #tpu.memory_space<smem>>, %arg7: memref<8x32xf32, #tpu.memory_space<vmem>>) attributes {dimension_semantics = [#tpu.dimension_semantics<parallel>], iteration_bounds = array<i64: 2>, scalar_prefetch = 0 : i64, scratch_operands = 0 : i64, tpu.core_type = #tpu.core_type<tc>, window_params = [{transform_indices = @transform_0, window_bounds = array<i64: 8, 32>}, {pipeline_mode = #tpu.pipeline_mode<synchronous>, transform_indices = @transform_1, window_bounds = array<i64: 32, 128>}, {pipeline_mode = #tpu.pipeline_mode<synchronous>, transform_indices = @transform_2, window_bounds = array<i64: 1, 128>}, {pipeline_mode = #tpu.pipeline_mode<synchronous>, transform_indices = @transform_3, window_bounds = array<i64: 128, 32>}, {pipeline_mode = #tpu.pipeline_mode<synchronous>, transform_indices = @transform_4, window_bounds = array<i64: 1, 32>}, {transform_indices = @transform_5, window_bounds = array<i64: 1>}, {transform_indices = @transform_6, window_bounds = array<i64: 8, 32>}]} {
    %c0 = arith.constant 0 : index
    %c0_0 = arith.constant 0 : index
    %0 = vector.load %arg1[%c0, %c0_0] : memref<8x32xf32, #tpu.memory_space<vmem>>, vector<8x32xf32>
    %c0_1 = arith.constant 0 : index
    %c0_2 = arith.constant 0 : index
    %1 = vector.load %arg2[%c0_1, %c0_2] : memref<32x128xf32, #tpu.memory_space<vmem>>, vector<32x128xf32>
    %cst = arith.constant dense<0.000000e+00> : vector<8x128xf32>
    %2 = tpu.matmul %0, %1, %cst {dimension_numbers = #tpu.dot_dimension_numbers<[1], [0], [0], [1], [0, 0, 1, 1], [], []>} : vector<8x32xf32>, vector<32x128xf32>, vector<8x128xf32> -> vector<8x128xf32>
    %c0_3 = arith.constant 0 : index
    %c0_4 = arith.constant 0 : index
    %3 = vector.load %arg3[%c0_3, %c0_4] : memref<1x128xf32, #tpu.memory_space<vmem>>, vector<1x128xf32>
    %4 = vector.broadcast %3 : vector<1x128xf32> to vector<8x128xf32>
    %5 = arith.addf %2, %4 : vector<8x128xf32>
    %cst_5 = arith.constant 0.000000e+00 : f32
    %6 = vector.broadcast %cst_5 : f32 to vector<8x128xf32>
    %7 = arith.maximumf %5, %6 : vector<8x128xf32>
    %c0_6 = arith.constant 0 : index
    %c0_7 = arith.constant 0 : index
    %8 = vector.load %arg4[%c0_6, %c0_7] : memref<128x32xf32, #tpu.memory_space<vmem>>, vector<128x32xf32>
    %cst_8 = arith.constant dense<0.000000e+00> : vector<8x32xf32>
    %9 = tpu.matmul %7, %8, %cst_8 {dimension_numbers = #tpu.dot_dimension_numbers<[1], [0], [0], [1], [0, 0, 1, 1], [], []>} : vector<8x128xf32>, vector<128x32xf32>, vector<8x32xf32> -> vector<8x32xf32>
    %c0_9 = arith.constant 0 : index
    %c0_10 = arith.constant 0 : index
    %10 = vector.load %arg5[%c0_9, %c0_10] : memref<1x32xf32, #tpu.memory_space<vmem>>, vector<1x32xf32>
    %11 = vector.broadcast %10 : vector<1x32xf32> to vector<8x32xf32>
    %12 = arith.addf %9, %11 : vector<8x32xf32>
    %c0_11 = arith.constant 0 : index
    %13 = memref.load %arg6[%c0_11] : memref<1xf32, #tpu.memory_space<smem>>
    %14 = vector.broadcast %13 : f32 to vector<8x32xf32>
    %15 = arith.mulf %12, %14 : vector<8x32xf32>
    %c0_12 = arith.constant 0 : index
    %c0_13 = arith.constant 0 : index
    %16 = vector.load %arg7[%c0_12, %c0_13] : memref<8x32xf32, #tpu.memory_space<vmem>>, vector<8x32xf32>
    tpu.vector_store %arg7[%c0_12, %c0_13], %15 {strides = array<i32>} : memref<8x32xf32, #tpu.memory_space<vmem>>, vector<8x32xf32>,
    return
  }
  func.func @transform_0(%arg0: i32) -> (i32, i32) {
    %c0_i32 = arith.constant 0 : i32
    %c0_i32_0 = arith.constant 0 : i32
    return %arg0, %c0_i32 : i32, i32
  }
  func.func @transform_1(%arg0: i32) -> (i32, i32) {
    %c0_i32 = arith.constant 0 : i32
    %c0_i32_0 = arith.constant 0 : i32
    %c0_i32_1 = arith.constant 0 : i32
    return %c0_i32, %c0_i32_0 : i32, i32
  }
  func.func @transform_2(%arg0: i32) -> (i32, i32) {
    %c0_i32 = arith.constant 0 : i32
    %c0_i32_0 = arith.constant 0 : i32
    %c0_i32_1 = arith.constant 0 : i32
    return %c0_i32, %c0_i32_0 : i32, i32
  }
  func.func @transform_3(%arg0: i32) -> (i32, i32) {
    %c0_i32 = arith.constant 0 : i32
    %c0_i32_0 = arith.constant 0 : i32
    %c0_i32_1 = arith.constant 0 : i32
    return %c0_i32, %c0_i32_0 : i32, i32
  }
  func.func @transform_4(%arg0: i32) -> (i32, i32) {
    %c0_i32 = arith.constant 0 : i32
    %c0_i32_0 = arith.constant 0 : i32
    %c0_i32_1 = arith.constant 0 : i32
    return %c0_i32, %c0_i32_0 : i32, i32
  }
  func.func @transform_5(%arg0: i32) -> i32 {
    %c0_i32 = arith.constant 0 : i32
    %c0_i32_0 = arith.constant 0 : i32
    return %c0_i32 : i32
  }
  func.func @transform_6(%arg0: i32) -> (i32, i32) {
    %c0_i32 = arith.constant 0 : i32
    %c0_i32_0 = arith.constant 0 : i32
    return %arg0, %c0_i32 : i32, i32
  }
}

</mosaic_0001>

<bundles_post_ra>
// kernel: tpu_custom_call.1
= control target key start
LH: loop header
LB: loop body
LE: loop exit
PB: predicated region body
PF: predicated region fallthrough
CT: control target
= control target key end

     0   :  { %s708_s0 = inlined_call_operand.vmem [shape: f32[16,32], index: 0, kind: input, shape index: {}]   ;;  %s709_s1 = inlined_call_operand.vmem [shape: f32[32,128], index: 1, kind: input, shape index: {}]   ;;  %s710_s2 = inlined_call_operand.vmem [shape: f32[1,128], index: 2, kind: input, shape index: {}]   ;;  %s711_s3 = inlined_call_operand.vmem [shape: f32[128,32], index: 3, kind: input, shape index: {}]   ;;  %s712_s4 = inlined_call_operand.vmem [shape: f32[1,32], index: 4, kind: input, shape index: {}]   ;;  %s713_s5 = inlined_call_operand.<no memory space> [shape: f32[1], index: 5, kind: input, shape index: {}]   ;;  %s714_s6 = inlined_call_operand.hbm [shape: f32[16,32], index: 6, kind: output, shape index: {}]  }
   0x1   :  { %11 = sst [smem:[#allocation2]] %s713_s5 }
   0x2   :  { %12 = vsyncpa [#allocation4], 0 }
   0x3   :  { %14 = vsyncpa [#allocation4 + $0x1], 0  ;;  %s555_s23 = smov 0   ;;  %s557_s24 = smov 0  }
   0x4   :  { %s559_s25 = smov 0   ;;  %s561_s26 = smov 0  }
   0x5 LB: > { %s576_s5 = sadd.s32 4294967295, %s515_s26   ;;  %s401_s27 = sadd.s32 4294967294, %s515_s26   ;;  %s515_s26 = sphi %s561_s26, %s720_s26   ;;  %s511_s25 = sphi %s559_s25, %s719_s25   ;;  %s507_s24 = sphi %s557_s24, %s718_s24   ;;  %s503_s23 = sphi %s555_s23, %s717_s23  }
   0x6   : > { %s580_s28 = sadd.s32 1, %s515_s26   ;;  %s158_s29 = sadd.s32 1, %s511_s25 }
   0x7   : > { %s155_s30 = ssub.s32 %s515_s26, %s580_s28  ;;  %p168_p0 = scmp.ne.s32.totalorder %s511_s25, %s507_s24 }
   0x8   : > { %p156_p1 = scmp.eq.s32.totalorder %s155_s30, 0  ;;  %p169_p2 = scmp.eq.s32.totalorder %s576_s5, 1 }
   0x9   : > { %p174_p3 = scmp.ne.s32.totalorder %s507_s24, %s503_s23  ;;  %p175_p4 = scmp.eq.s32.totalorder %s401_s27, 1 }
   0xa   : > { %s591_s7 = scalar_select %p156_p1, %s511_s25, %s158_s29  }
   0xb   : > { %p593_p5 = por %p169_p2, %p168_p0  ;;  %p597_p6 = por %p175_p4, %p174_p3 }
   0xc   : > { %p404_p7 = scmp.ge.s32.totalorder %s515_s26, 1  ;;  %p215_p8 = scmp.lt.s32.totalorder %s515_s26, 3 }
   0xe   : > { %p216_p9 = pnand %p404_p7, %p215_p8 }
   0xf   : > { %p244_p10 = scmp.lt.s32.totalorder (!%p216_p9), %s576_s5, 1  ;;  %s322_s10 = sld [smem:[#allocation2]] (!%p216_p9) }
  0x10   : > { %219 = sbr.rel (%p216_p9) target bundleno = 292 (0x124), region = 44 }
  0x15   : > { %v252_v0 = vld [vmem:[%s709_s1 + $0x18] sm:$0xff]  ;;  %v251_v1 = vld [vmem:[%s709_s1 + $0x10] sm:$0xff]  ;;  %v250_v4 = vld [vmem:[%s709_s1 + $0x8] sm:$0xff]  ;;  %s245_s20 = scalar_select %p244_p10, %s576_s5, 1  ;;  %vm257_vm0 = vcmask 261120   ;;  %v323_v27 = vstv %s322_s10 }
  0x16   : > { %273 = vmatpush.msra.mxu0 %v252_v0  ;;  %v297_v2 = vld [vmem:[%s711_s3 + $0x78] sm:$0xff]  ;;  %v296_v3 = vld [vmem:[%s711_s3 + $0x70] sm:$0xff]  ;;  %v295_v5 = vld [vmem:[%s711_s3 + $0x68] sm:$0xff]  ;;  %s473_s10 = scalar_lea.hbm %s714_s6, 16 }
  0x17   : > { %302 = vmatpush.msra.mxu1 %v297_v2  ;;  %v249_v6 = vld [vmem:[%s709_s1] sm:$0xff]  ;;  %s406_s30 = sshll.u32 %s245_s20, 3  ;;  %v293_v9 = vld [vmem:[%s711_s3 + $0x58] sm:$0xff]  ;;  %v292_v10 = vld [vmem:[%s711_s3 + $0x50] sm:$0xff] }
  0x18   : > { %274 = vmatpush.msra.mxu0 %v251_v1  ;;  %s247_s12 = scalar_lea.vmem %s708_s0, %s406_s30  ;;  %v294_v7 = vld [vmem:[%s711_s3 + $0x60] sm:$0xff]  ;;  %v291_v11 = vld [vmem:[%s711_s3 + $0x48] sm:$0xff]  ;;  %v289_v13 = vld [vmem:[%s711_s3 + $0x38] sm:$0xff]  ;;  %s241_s30 = sand.u32 1, %s507_s24  }
  0x19   : > { %303 = vmatpush.msra.mxu1 %v296_v3  ;;  %v248_v8 = vld [vmem:[%s247_s12] sm:$0xff]  ;;  %v288_v14 = vld [vmem:[%s711_s3 + $0x30] sm:$0xff]  ;;  %v287_v15 = vld [vmem:[%s711_s3 + $0x28] sm:$0xff]  ;;  %s405_s11 = sshll.u32 %s241_s30, 3  ;;  %s409_s12 = sshll.u32 %s576_s5, 3 }
  0x1a   : > { %275 = vmatpush.msra.mxu0 %v250_v4  ;;  %v290_v12 = vld [vmem:[%s711_s3 + $0x40] sm:$0xff]  ;;  %v285_v17 = vld [vmem:[%s711_s3 + $0x18] sm:$0xff]  ;;  %v284_v18 = vld [vmem:[%s711_s3 + $0x10] sm:$0xff]  ;;  %s337_s17 = scalar_lea.hbm %s714_s6, %s409_s12  ;;  %s243_s18 = scalar_lea.vmem [#allocation3], %s405_s11 }
  0x1b   : > { %304 = vmatpush.msra.mxu1 %v295_v5  ;;  %v286_v16 = vld [vmem:[%s711_s3 + $0x20] sm:$0xff]  ;;  %v283_v19 = vld [vmem:[%s711_s3 + $0x8] sm:$0xff]  ;;  %s339_s19 = sshll.u32 %s243_s18, 4  ;;  %s341_s20 = sshll.u32 %s337_s17, 4  ;;  %s340_s19 = int_to_ptr.vmem [resolvable:$true] %s339_s19  ;;  %s342_s20 = int_to_ptr.hbm [resolvable:$true] %s341_s20 }
  0x1c   : > { %276 = vmatpush.msra.mxu0 %v249_v6  ;;  %v282_v20 = vld [vmem:[%s711_s3] sm:$0xff]  ;;  %s327_s5 = scalar_lea.sflag [#allocation4], %s241_s30  ;;  %s467_s21 = sshra.s32 %s342_s20, 4  ;;  %s468_s21 = int_to_ptr.hbm [resolvable:$true] %s467_s21 }
  0x1d   : > { %407 = vmatmul.msk.f32.vlgmr.msra.gmra.mxu0 %vm257_vm0, %v248_v8  ;;  %305 = vmatpush.msra.mxu1 %v294_v7  ;;  %v451_v21 = vld [vmem:[%s710_s2] ss:$0 sm:$0xff]  ;;  %s469_s22 = scalar_lea.hbm %s468_s21, 8  ;;  %p474_p0 = scmp.lt.s32.totalorder %s468_s21, %s714_s6 }
  0x1e   : > { %v452_v25 = vld [vmem:[%s712_s4] ss:$0 sm:$0xff]  ;;  %p470_p11 = scmp.ne.s32.totalorder %s468_s21, %s469_s22  ;;  %p475_p1 = scmp.lt.s32.totalorder %s473_s10, %s469_s22 }
  0x1f   : > { %306 = vmatpush.msra.mxu1 %v293_v9 }
  0x20   : > { %p471_p12 = pnand %p470_p11, %p593_p5  ;;  %p476_p2 = por %p475_p1, %p474_p0 }
  0x21   : > { %307 = vmatpush.msra.mxu1 %v292_v10 }
  0x22   : > { %p472_p13 = pneg %p471_p12 }
  0x23   : > { %308 = vmatpush.msra.mxu1 %v291_v11 }
  0x24   : > { %p477_p3 = pnand %p476_p2, %p472_p13 }
  0x25   : > { %309 = vmatpush.msra.mxu1 %v290_v12 }
  0x27   : > { %310 = vmatpush.msra.mxu1 %v289_v13 }
  0x29   : > { %311 = vmatpush.msra.mxu1 %v288_v14 }
  0x2b   : > { %312 = vmatpush.msra.mxu1 %v287_v15 }
  0x2d   : > { %313 = vmatpush.msra.mxu1 %v286_v16 }
  0x2f   : > { %314 = vmatpush.msra.mxu1 %v285_v17 }
  0x31   : > { %315 = vmatpush.msra.mxu1 %v284_v18 }
  0x33   : > { %316 = vmatpush.msra.mxu1 %v283_v19 }
  0x35   : > { %317 = vmatpush.msra.mxu1 %v282_v20 }
  0x9a   : > { %v278_v22 = vpop.f32.mrf.mxu0 }
  0x9b   : > { %v279_v23 = vadd.f32 %v451_v21, %v278_v22 }
  0x9d   : > { %v281_v24 = vmax.f32 %v279_v23, 0.0 }
  0x9f   : > { %318 = vmatmul.f32.vlgmr.msra.gmra.mxu1 %v281_v24 }
 0x11c   : > { %v319_v26 = vpop.f32.mrf.mxu1 }
 0x11d   : > { %v320_v28 = vadd.f32 %v452_v25, %v319_v26 }
 0x11f   : > { %v324_v29 = vmul.f32 %v323_v27, %v320_v28 }
 0x121   : > { %325 = vst.msk [vmem:[%s243_s18] sm:$0xff] %vm257_vm0, %v324_v29 }
 0x122   : > { %480 = shalt.err (!%p477_p3)
}
 0x123   : > { %412 = dma.vmem_to_hbm [thread:$0]  (%p593_p5), %s340_s19, 128, %s342_s20, %s327_s5  }
 0x124 PF: > { %p418_p4 = scmp.ge.s32.totalorder %s515_s26, 2  ;;  %s353_s30 = sand.u32 1, %s503_s23  }
 0x125   : > { %s354_s13 = scalar_lea.sflag [#allocation4], %s353_s30 }
 0x126   : > { %p415_p7 = pnand %p418_p4, %p597_p6 }
 0x128   : > { %p416_p8 = pneg %p415_p7 }
 0x12a   : > { %498 = dma.done.wait (%p416_p8), %s354_s13, 128  }
 0x12b   : > { %500 = vsyncadd (%p416_p8), %s354_s13, 4294967168  ;;  %p17_p9 = scmp.ge.s32.totalorder %s580_s28, 4   ;;  %s717_s23 = smov %s507_s24 }
 0x12c   : > { %s718_s24 = smov %s511_s25  ;;  %s719_s25 = smov %s591_s7 }
 0x12d   : > { %s720_s26 = smov %s580_s28  ;;  %19 = sbr.rel (!%p17_p9) target bundleno = 5 (0x5), region = 79 }
 0x132   :  { %360 = vsyncpa [#allocation4], 1 }
 0x133   :  { %362 = vsyncpa [#allocation4 + $0x1], 1 }

// kernel: tpu_custom_call.1
= control target key start
LH: loop header
LB: loop body
LE: loop exit
PB: predicated region body
PF: predicated region fallthrough
CT: control target
= control target key end

     0   :  { %s708_s0 = inlined_call_operand.vmem [shape: f32[16,32], index: 0, kind: input, shape index: {}]   ;;  %s709_s1 = inlined_call_operand.vmem [shape: f32[32,128], index: 1, kind: input, shape index: {}]   ;;  %s710_s2 = inlined_call_operand.vmem [shape: f32[1,128], index: 2, kind: input, shape index: {}]   ;;  %s711_s3 = inlined_call_operand.vmem [shape: f32[128,32], index: 3, kind: input, shape index: {}]   ;;  %s712_s4 = inlined_call_operand.vmem [shape: f32[1,32], index: 4, kind: input, shape index: {}]   ;;  %s713_s5 = inlined_call_operand.<no memory space> [shape: f32[1], index: 5, kind: input, shape index: {}]   ;;  %s714_s6 = inlined_call_operand.hbm [shape: f32[16,32], index: 6, kind: output, shape index: {}]  }
   0x1   :  { %11 = sst [smem:[#allocation2]] %s713_s5 }
   0x2   :  { %12 = vsyncpa [#allocation4], 0 }
   0x3   :  { %14 = vsyncpa [#allocation4 + $0x1], 0  ;;  %s555_s23 = smov 0   ;;  %s557_s24 = smov 0  }
   0x4   :  { %s559_s25 = smov 0   ;;  %s561_s26 = smov 0  }
   0x5 LB: > { %s576_s5 = sadd.s32 4294967295, %s515_s26   ;;  %s401_s27 = sadd.s32 4294967294, %s515_s26   ;;  %s515_s26 = sphi %s561_s26, %s720_s26   ;;  %s511_s25 = sphi %s559_s25, %s719_s25   ;;  %s507_s24 = sphi %s557_s24, %s718_s24   ;;  %s503_s23 = sphi %s555_s23, %s717_s23  }
   0x6   : > { %s580_s28 = sadd.s32 1, %s515_s26   ;;  %s158_s29 = sadd.s32 1, %s511_s25 }
   0x7   : > { %s155_s30 = ssub.s32 %s515_s26, %s580_s28  ;;  %p168_p0 = scmp.ne.s32.totalorder %s511_s25, %s507_s24 }
   0x8   : > { %p156_p1 = scmp.eq.s32.totalorder %s155_s30, 0  ;;  %p169_p2 = scmp.eq.s32.totalorder %s576_s5, 1 }
   0x9   : > { %p174_p3 = scmp.ne.s32.totalorder %s507_s24, %s503_s23  ;;  %p175_p4 = scmp.eq.s32.totalorder %s401_s27, 1 }
   0xa   : > { %s591_s7 = scalar_select %p156_p1, %s511_s25, %s158_s29  }
   0xb   : > { %p593_p5 = por %p169_p2, %p168_p0  ;;  %p597_p6 = por %p175_p4, %p174_p3 }
   0xc   : > { %p404_p7 = scmp.ge.s32.totalorder %s515_s26, 1  ;;  %p215_p8 = scmp.lt.s32.totalorder %s515_s26, 3 }
   0xe   : > { %p216_p9 = pnand %p404_p7, %p215_p8 }
   0xf   : > { %p244_p10 = scmp.lt.s32.totalorder (!%p216_p9), %s576_s5, 1  ;;  %s322_s10 = sld [smem:[#allocation2]] (!%p216_p9) }
  0x10   : > { %219 = sbr.rel (%p216_p9) target bundleno = 292 (0x124), region = 44 }
  0x15   : > { %v252_v0 = vld [vmem:[%s709_s1 + $0x18] sm:$0xff]  ;;  %v251_v1 = vld [vmem:[%s709_s1 + $0x10] sm:$0xff]  ;;  %v250_v4 = vld [vmem:[%s709_s1 + $0x8] sm:$0xff]  ;;  %s245_s20 = scalar_select %p244_p10, %s576_s5, 1  ;;  %vm257_vm0 = vcmask 261120   ;;  %v323_v27 = vstv %s322_s10 }
  0x16   : > { %273 = vmatpush.msra.mxu0 %v252_v0  ;;  %v297_v2 = vld [vmem:[%s711_s3 + $0x78] sm:$0xff]  ;;  %v296_v3 = vld [vmem:[%s711_s3 + $0x70] sm:$0xff]  ;;  %v295_v5 = vld [vmem:[%s711_s3 + $0x68] sm:$0xff]  ;;  %s473_s10 = scalar_lea.hbm %s714_s6, 16 }
  0x17   : > { %302 = vmatpush.msra.mxu1 %v297_v2  ;;  %v249_v6 = vld [vmem:[%s709_s1] sm:$0xff]  ;;  %s406_s30 = sshll.u32 %s245_s20, 3  ;;  %v293_v9 = vld [vmem:[%s711_s3 + $0x58] sm:$0xff]  ;;  %v292_v10 = vld [vmem:[%s711_s3 + $0x50] sm:$0xff] }
  0x18   : > { %274 = vmatpush.msra.mxu0 %v251_v1  ;;  %s247_s12 = scalar_lea.vmem %s708_s0, %s406_s30  ;;  %v294_v7 = vld [vmem:[%s711_s3 + $0x60] sm:$0xff]  ;;  %v291_v11 = vld [vmem:[%s711_s3 + $0x48] sm:$0xff]  ;;  %v289_v13 = vld [vmem:[%s711_s3 + $0x38] sm:$0xff]  ;;  %s241_s30 = sand.u32 1, %s507_s24  }
  0x19   : > { %303 = vmatpush.msra.mxu1 %v296_v3  ;;  %v248_v8 = vld [vmem:[%s247_s12] sm:$0xff]  ;;  %v288_v14 = vld [vmem:[%s711_s3 + $0x30] sm:$0xff]  ;;  %v287_v15 = vld [vmem:[%s711_s3 + $0x28] sm:$0xff]  ;;  %s405_s11 = sshll.u32 %s241_s30, 3  ;;  %s409_s12 = sshll.u32 %s576_s5, 3 }
  0x1a   : > { %275 = vmatpush.msra.mxu0 %v250_v4  ;;  %v290_v12 = vld [vmem:[%s711_s3 + $0x40] sm:$0xff]  ;;  %v285_v17 = vld [vmem:[%s711_s3 + $0x18] sm:$0xff]  ;;  %v284_v18 = vld [vmem:[%s711_s3 + $0x10] sm:$0xff]  ;;  %s337_s17 = scalar_lea.hbm %s714_s6, %s409_s12  ;;  %s243_s18 = scalar_lea.vmem [#allocation3], %s405_s11 }
  0x1b   : > { %304 = vmatpush.msra.mxu1 %v295_v5  ;;  %v286_v16 = vld [vmem:[%s711_s3 + $0x20] sm:$0xff]  ;;  %v283_v19 = vld [vmem:[%s711_s3 + $0x8] sm:$0xff]  ;;  %s339_s19 = sshll.u32 %s243_s18, 4  ;;  %s341_s20 = sshll.u32 %s337_s17, 4  ;;  %s340_s19 = int_to_ptr.vmem [resolvable:$true] %s339_s19  ;;  %s342_s20 = int_to_ptr.hbm [resolvable:$true] %s341_s20 }
  0x1c   : > { %276 = vmatpush.msra.mxu0 %v249_v6  ;;  %v282_v20 = vld [vmem:[%s711_s3] sm:$0xff]  ;;  %s327_s5 = scalar_lea.sflag [#allocation4], %s241_s30  ;;  %s467_s21 = sshra.s32 %s342_s20, 4  ;;  %s468_s21 = int_to_ptr.hbm [resolvable:$true] %s467_s21 }
  0x1d   : > { %407 = vmatmul.msk.f32.vlgmr.msra.gmra.mxu0 %vm257_vm0, %v248_v8  ;;  %305 = vmatpush.msra.mxu1 %v294_v7  ;;  %v451_v21 = vld [vmem:[%s710_s2] ss:$0 sm:$0xff]  ;;  %s469_s22 = scalar_lea.hbm %s468_s21, 8  ;;  %p474_p0 = scmp.lt.s32.totalorder %s468_s21, %s714_s6 }
  0x1e   : > { %v452_v25 = vld [vmem:[%s712_s4] ss:$0 sm:$0xff]  ;;  %p470_p11 = scmp.ne.s32.totalorder %s468_s21, %s469_s22  ;;  %p475_p1 = scmp.lt.s32.totalorder %s473_s10, %s469_s22 }
  0x1f   : > { %306 = vmatpush.msra.mxu1 %v293_v9 }
  0x20   : > { %p471_p12 = pnand %p470_p11, %p593_p5  ;;  %p476_p2 = por %p475_p1, %p474_p0 }
  0x21   : > { %307 = vmatpush.msra.mxu1 %v292_v10 }
  0x22   : > { %p472_p13 = pneg %p471_p12 }
  0x23   : > { %308 = vmatpush.msra.mxu1 %v291_v11 }
  0x24   : > { %p477_p3 = pnand %p476_p2, %p472_p13 }
  0x25   : > { %309 = vmatpush.msra.mxu1 %v290_v12 }
  0x27   : > { %310 = vmatpush.msra.mxu1 %v289_v13 }
  0x29   : > { %311 = vmatpush.msra.mxu1 %v288_v14 }
  0x2b   : > { %312 = vmatpush.msra.mxu1 %v287_v15 }
  0x2d   : > { %313 = vmatpush.msra.mxu1 %v286_v16 }
  0x2f   : > { %314 = vmatpush.msra.mxu1 %v285_v17 }
  0x31   : > { %315 = vmatpush.msra.mxu1 %v284_v18 }
  0x33   : > { %316 = vmatpush.msra.mxu1 %v283_v19 }
  0x35   : > { %317 = vmatpush.msra.mxu1 %v282_v20 }
  0x9a   : > { %v278_v22 = vpop.f32.mrf.mxu0 }
  0x9b   : > { %v279_v23 = vadd.f32 %v451_v21, %v278_v22 }
  0x9d   : > { %v281_v24 = vmax.f32 %v279_v23, 0.0 }
  0x9f   : > { %318 = vmatmul.f32.vlgmr.msra.gmra.mxu1 %v281_v24 }
 0x11c   : > { %v319_v26 = vpop.f32.mrf.mxu1 }
 0x11d   : > { %v320_v28 = vadd.f32 %v452_v25, %v319_v26 }
 0x11f   : > { %v324_v29 = vmul.f32 %v323_v27, %v320_v28 }
 0x121   : > { %325 = vst.msk [vmem:[%s243_s18] sm:$0xff] %vm257_vm0, %v324_v29 }
 0x122   : > { %480 = shalt.err (!%p477_p3)
}
 0x123   : > { %412 = dma.vmem_to_hbm [thread:$0]  (%p593_p5), %s340_s19, 128, %s342_s20, %s327_s5  }
 0x124 PF: > { %p418_p4 = scmp.ge.s32.totalorder %s515_s26, 2  ;;  %s353_s30 = sand.u32 1, %s503_s23  }
 0x125   : > { %s354_s13 = scalar_lea.sflag [#allocation4], %s353_s30 }
 0x126   : > { %p415_p7 = pnand %p418_p4, %p597_p6 }
 0x128   : > { %p416_p8 = pneg %p415_p7 }
 0x12a   : > { %498 = dma.done.wait (%p416_p8), %s354_s13, 128  }
 0x12b   : > { %500 = vsyncadd (%p416_p8), %s354_s13, 4294967168  ;;  %p17_p9 = scmp.ge.s32.totalorder %s580_s28, 4   ;;  %s717_s23 = smov %s507_s24 }
 0x12c   : > { %s718_s24 = smov %s511_s25  ;;  %s719_s25 = smov %s591_s7 }
 0x12d   : > { %s720_s26 = smov %s580_s28  ;;  %19 = sbr.rel (!%p17_p9) target bundleno = 5 (0x5), region = 79 }
 0x132   :  { %360 = vsyncpa [#allocation4], 1 }
 0x133   :  { %362 = vsyncpa [#allocation4 + $0x1], 1 }

</bundles_post_ra>
